<compile_context>
chip_gen: v6e
topology: v6e:2x2x1
jax: 0.10.0
libtpu: 0.0.40
codegen_flags: <defaults>
</compile_context>

<pallas_src>
import functools

import jax
import jax.numpy as jnp
from jax.experimental import pallas as pl
from jax.experimental.pallas import tpu as pltpu


def _swish_kernel(x_ref, o_ref, *, compute_dtype):
    # x_ref / o_ref: (block_rows, lane) tile in VMEM.
    x = x_ref[...].astype(compute_dtype)
    # sigmoid(x) = 0.5 * tanh(0.5 * x) + 0.5 : tanh -> EUP slot, muls/add -> VPU.
    sig = jnp.tanh(x * 0.5) * 0.5 + 0.5
    o_ref[...] = (x * sig).astype(o_ref.dtype)


def _xla_swish(x):
    """Fused XLA fallback (tiny or ragged inputs): already 1 read + 1 write."""
    if not jnp.issubdtype(x.dtype, jnp.floating):
        xf = x.astype(jnp.float32)
        return (xf * jax.nn.sigmoid(xf)).astype(x.dtype)
    return x * jax.nn.sigmoid(x)


def _pick_lane(n):
    for lane in (1024, 512, 256, 128):
        if n % lane == 0:
            return lane
    return None


def _round_up(a, b):
    return ((a + b - 1) // b) * b


def swish(x, *, target_block_bytes=4 * 1024 * 1024, min_pallas_elems=1 << 16):
    """Elementwise Swish. Pallas path for aligned float tensors, XLA otherwise."""
    orig_shape = x.shape
    dtype = x.dtype
    n = x.size
    if n == 0:
        return x
    if not jnp.issubdtype(dtype, jnp.floating):
        return _xla_swish(x)

    lane = _pick_lane(n)
    if lane is None or n < min_pallas_elems:
        # Ragged total size or tiny tensor: fused XLA is roofline-optimal and
        # avoids the pad/concat + output-slice copies (~3x traffic) entirely.
        return _xla_swish(x)

    itemsize = dtype.itemsize
    sub = max(8, 32 // itemsize)  # sublane multiple: 8 (f32), 16 (bf16), 32 (int8)
    if dtype == jnp.dtype(jnp.float32) or dtype == jnp.dtype(jnp.bfloat16):
        compute_dtype = dtype     # native bf16 math on v6e/v7x; f32 stays f32
    else:
        compute_dtype = jnp.float32

    rows = n // lane
    slab = x.reshape(rows, lane)  # pure bitcast, no copy

    if rows <= sub:
        # Tiny slab: single full-extent block (block dims == array dims).
        block_rows = rows
    else:
        # Target ~4 MiB blocks, but keep >= 2 (even) balanced grid steps so
        # both v7x TensorCores stay busy under dimension_semantics=parallel.
        target_rows = max(sub, (target_block_bytes // (lane * itemsize)) // sub * sub)
        n_steps = max(2, pl.cdiv(rows, target_rows))
        n_steps += n_steps % 2
        block_rows = min(_round_up(pl.cdiv(rows, n_steps), sub), target_rows)

    grid = (pl.cdiv(rows, block_rows),)

    out = pl.pallas_call(
        functools.partial(_swish_kernel, compute_dtype=compute_dtype),
        out_shape=jax.ShapeDtypeStruct((rows, lane), dtype),
        grid=grid,
        in_specs=[pl.BlockSpec((block_rows, lane), lambda i: (i, 0))],
        out_specs=pl.BlockSpec((block_rows, lane), lambda i: (i, 0)),
        compiler_params=pltpu.CompilerParams(
            dimension_semantics=("parallel",),
            vmem_limit_bytes=40 * 1024 * 1024,  # covers 2 arrays x 2 bufs x 4 MiB
        ),
    )(slab)

    return out.reshape(orig_shape)


# ---------------- pure-JAX reference ----------------
def _ref_swish(x):
    return x * jax.nn.sigmoid(x)


if __name__ == "__main__":
    key = jax.random.PRNGKey(0)
    k1, k2, k3, k4 = jax.random.split(key, 4)

    # PyTorch-style small input (B, C, H, W) = (2, 4, 16, 16); force the
    # Pallas path so the kernel itself is exercised even at this size.
    x = jax.random.normal(k1, (2, 4, 16, 16), jnp.float32)
    out = jax.block_until_ready(swish(x, min_pallas_elems=0))
    err = float(jnp.max(jnp.abs(out - _ref_swish(x))))
    assert out.shape == x.shape
    assert err < 2e-4, f"max abs err {err}"

    # Larger f32 input: multi-block, double-buffered, 2-step parallel grid.
    x_big = jax.random.normal(k2, (4, 64, 64, 64), jnp.float32)
    out_big = jax.block_until_ready(swish(x_big))
    err_big = float(jnp.max(jnp.abs(out_big - _ref_swish(x_big))))
    assert out_big.shape == x_big.shape
    assert err_big < 2e-4, f"max abs err {err_big}"

    # bf16 input: native bf16 compute in-kernel (16-row sublane rounding).
    x_bf = jax.random.normal(k3, (8, 128, 256), jnp.bfloat16)
    out_bf = jax.block_until_ready(swish(x_bf))
    ref_bf = _ref_swish(x_bf.astype(jnp.float32))
    err_bf = float(jnp.max(jnp.abs(out_bf.astype(jnp.float32) - ref_bf)))
    assert out_bf.shape == x_bf.shape
    assert err_bf < 1e-1, f"max abs err {err_bf}"

    # Ragged total size (n % 128 != 0): fused-XLA fallback, no pad/slice copies.
    x_rag = jax.random.normal(k4, (3, 5, 7, 11), jnp.float32)
    out_rag = jax.block_until_ready(swish(x_rag))
    err_rag = float(jnp.max(jnp.abs(out_rag - _ref_swish(x_rag))))
    assert out_rag.shape == x_rag.shape
    assert err_rag < 2e-4, f"max abs err {err_rag}"

    print("KERNEL_OK")
</pallas_src>

<mosaic_0001>
module attributes {stable_mosaic.version = 11 : i64} {
  func.func @_swish_kernel(%arg0: i32, %arg1: memref<2x1024xf32, #tpu.memory_space<vmem>>, %arg2: memref<2x1024xf32, #tpu.memory_space<vmem>>) attributes {dimension_semantics = [#tpu.dimension_semantics<parallel>], iteration_bounds = array<i64: 1>, scalar_prefetch = 0 : i64, scratch_operands = 0 : i64, tpu.core_type = #tpu.core_type<tc>, window_params = [{transform_indices = @transform_0, window_bounds = array<i64: 2, 1024>}, {transform_indices = @transform_1, window_bounds = array<i64: 2, 1024>}]} {
    %c0 = arith.constant 0 : index
    %c0_0 = arith.constant 0 : index
    %0 = vector.load %arg1[%c0, %c0_0] : memref<2x1024xf32, #tpu.memory_space<vmem>>, vector<2x1024xf32>
    %cst = arith.constant 5.000000e-01 : f32
    %1 = vector.broadcast %cst : f32 to vector<2x1024xf32>
    %2 = arith.mulf %0, %1 : vector<2x1024xf32>
    %3 = math.tanh %2 : vector<2x1024xf32>
    %cst_1 = arith.constant 5.000000e-01 : f32
    %4 = vector.broadcast %cst_1 : f32 to vector<2x1024xf32>
    %5 = arith.mulf %3, %4 : vector<2x1024xf32>
    %cst_2 = arith.constant 5.000000e-01 : f32
    %6 = vector.broadcast %cst_2 : f32 to vector<2x1024xf32>
    %7 = arith.addf %5, %6 : vector<2x1024xf32>
    %8 = arith.mulf %0, %7 : vector<2x1024xf32>
    %c0_3 = arith.constant 0 : index
    %c0_4 = arith.constant 0 : index
    %9 = vector.load %arg2[%c0_3, %c0_4] : memref<2x1024xf32, #tpu.memory_space<vmem>>, vector<2x1024xf32>
    tpu.vector_store %arg2[%c0_3, %c0_4], %8 {strides = array<i32>} : memref<2x1024xf32, #tpu.memory_space<vmem>>, vector<2x1024xf32>,
    return
  }
  func.func @transform_0(%arg0: i32) -> (i32, i32) {
    %c0_i32 = arith.constant 0 : i32
    %c0_i32_0 = arith.constant 0 : i32
    return %arg0, %c0_i32 : i32, i32
  }
  func.func @transform_1(%arg0: i32) -> (i32, i32) {
    %c0_i32 = arith.constant 0 : i32
    %c0_i32_0 = arith.constant 0 : i32
    return %arg0, %c0_i32 : i32, i32
  }
}

</mosaic_0001>

<bundles_post_ra>
// kernel: tpu_custom_call.1
= control target key start
LH: loop header
LB: loop body
LE: loop exit
PB: predicated region body
PF: predicated region fallthrough
CT: control target
= control target key end

     0   :  { %6 = vsyncpa [#allocation3], 0  ;;  %s118_s0 = inlined_call_operand.hbm [shape: f32[2,1024], index: 0, kind: input, shape index: {}]   ;;  %s119_s1 = inlined_call_operand.hbm [shape: f32[2,1024], index: 1, kind: output, shape index: {}]  }
   0x1   :  { %7 = vsyncpa [#allocation4], 0  ;;  %s100_s6 = smov [#allocation2]  }
   0x2   :  { %s14_s7 = sshll.u32 %s100_s6, 4  ;;  %s15_s7 = int_to_ptr.vmem [resolvable:$true] %s14_s7 }
   0x3   :  { %s64_s8 = scalar_lea.vmem %s15_s7, 256  ;;  %p69_p1 = scmp.lt.s32.totalorder %s15_s7, %s15_s7 }
   0x4   :  { %p65_p0 = scmp.ne.s32.totalorder %s15_s7, %s64_s8  ;;  %p70_p2 = scmp.lt.s32.totalorder %s64_s8, %s64_s8 }
   0x6   :  { %p71_p3 = por %p70_p2, %p69_p1 }
   0x8   :  { %p72_p4 = pnand %p71_p3, %p65_p0 }
   0xa   :  { %75 = shalt.err (!%p72_p4)
}
   0xb   :  { %17 = dma.hbm_to_vmem [thread:$0]  %s118_s0, 256, %s15_s7, [#allocation3]  }
   0xc   :  { %96 = dma.done.wait [#allocation3], 256  }
   0xd   :  { %97 = vsyncadd [#allocation3], 4294967040  ;;  %v21_v0 = vld [vmem:[#allocation2] sm:$0xff]  ;;  %v22_v1 = vld [vmem:[#allocation2 + $0x8] sm:$0xff]  ;;  %s101_s11 = smov [#allocation5]  }
   0xe   :  { %v23_v2 = vmul.f32 0.5, %v21_v0  ;;  %v24_v3 = vmul.f32 0.5, %v22_v1  ;;  %s41_s12 = sshll.u32 %s101_s11, 4  ;;  %s42_s12 = int_to_ptr.vmem [resolvable:$true] %s41_s12 }
   0xf   :  { %s76_s0 = scalar_lea.vmem %s42_s12, 256  ;;  %p81_p6 = scmp.lt.s32.totalorder %s42_s12, %s42_s12 }
  0x10   :  { %52 = vtanh.f32 %v23_v2  ;;  %p77_p5 = scmp.ne.s32.totalorder %s42_s12, %s76_s0  ;;  %p82_p7 = scmp.lt.s32.totalorder %s76_s0, %s76_s0 }
  0x11   :  { %54 = vtanh.f32 %v24_v3 }
  0x12   :  { %p83_p8 = por %p82_p7, %p81_p6 }
  0x14   :  { %p84_p9 = pnand %p83_p8, %p77_p5 }
  0x1d   :  { %v53_v4 = vpop.eup %52 }
  0x1e   :  { %v55_v5 = vpop.eup %54  ;;  %v27_v6 = vmul.f32 0.5, %v53_v4 }
  0x1f   :  { %v28_v7 = vmul.f32 0.5, %v55_v5 }
  0x20   :  { %v29_v8 = vadd.f32 0.5, %v27_v6 }
  0x21   :  { %v30_v9 = vadd.f32 0.5, %v28_v7 }
  0x22   :  { %v31_v10 = vmul.f32 %v29_v8, %v21_v0 }
  0x23   :  { %v32_v11 = vmul.f32 %v30_v9, %v22_v1 }
  0x24   :  { %33 = vst [vmem:[#allocation5] sm:$0xff] %v31_v10 }
  0x25   :  { %34 = vst [vmem:[#allocation5 + $0x8] sm:$0xff] %v32_v11 }
  0x26   :  { %87 = shalt.err (!%p84_p9)
}
  0x27   :  { %44 = dma.vmem_to_hbm [thread:$0]  %s42_s12, 256, %s119_s1, [#allocation4]  }
  0x28   :  { %98 = dma.done.wait [#allocation4], 256  }
  0x29   :  { %99 = vsyncadd [#allocation4], 4294967040 }
  0x2a   :  { %48 = vsyncpa [#allocation3], 1 }
  0x2b   :  { %49 = vsyncpa [#allocation4], 1 }

</bundles_post_ra>
